<compile_context>
chip_gen: v6e
topology: v6e:2x2x1
jax: 0.10.0
libtpu: 0.0.40
codegen_flags: <defaults>
</compile_context>

<pallas_src>
import functools
import math

import jax
import jax.numpy as jnp
from jax.experimental import pallas as pl
from jax.experimental.pallas import tpu as pltpu


def _round_up(n, m):
    return ((n + m - 1) // m) * m


def _vmem_capacity_bytes():
    """Generation-aware VMEM capacity (v5e/v6e: 128 MiB, v7x: 64 MiB/TC)."""
    try:
        cap = getattr(pltpu.get_tpu_info(), "vmem_capacity_bytes", None)
        if cap:
            return int(cap)
    except Exception:
        pass
    return 64 << 20  # conservative default (v7x per-TensorCore VMEM)


def _time_fold_factor(F, T):
    """Largest g that divides T with g*F approaching 128 lanes (g = 128//F)."""
    if F >= 128 or T <= 0:
        return 1
    return max(1, math.gcd(max(1, 128 // F), T))


def _pick_batch_tile(B):
    """Batch tile: full extent for tiny B; otherwise a multiple of 8 that
    yields >= 2 tiles (v7x megacore) and preferably divides B (no pad copy)."""
    if B <= 8:
        return B
    cap = min(128, _round_up(-(-B // 2), 8))
    t = cap
    while t >= 8:
        if B % t == 0:
            return t
        t -= 8
    return cap


def _pick_time_tile(Tg, pack, cap):
    """Time tile over the folded axis: full extent if it fits the VMEM cap,
    else the largest pack-multiple divisor of Tg <= cap (no pad copy), else a
    pack-multiple cap (caller pads -- rare fallback)."""
    cap = max(int(cap), 1)
    if Tg <= cap:
        return Tg
    best = 0
    t = pack
    while t <= min(cap, Tg):
        if Tg % t == 0:
            best = t
        t += pack
    if best:
        return best
    return max(pack, (cap // pack) * pack)


def _clap_classifier_kernel(x_ref, wp_ref, bp_ref, wl_ref, bl_ref, o_ref,
                            acc_ref, *, inv_t):
    """grid = (batch tiles [parallel], folded-time tiles [arbitrary reduce])."""
    t = pl.program_id(1)

    @pl.when(t == 0)
    def _init():
        acc_ref[...] = jnp.zeros_like(acc_ref)

    # Stream x in its native dtype (bf16 halves HBM bytes); accumulate in f32.
    acc_ref[...] += jnp.sum(x_ref[...].astype(jnp.float32), axis=1)

    @pl.when(t == pl.num_programs(1) - 1)
    def _finalize():
        # acc holds folded partial sums (tb, g*F); dividing by the true T gives
        # the folded mean, and wp was pre-tiled g times, so
        # pooled_folded @ wp_tiled == mean_pool(x) @ w_proj exactly.
        pooled = acc_ref[...] * inv_t                                     # (tb, gF)

        # synthetic CLAP projection -> audio embeddings
        emb = jnp.dot(pooled.astype(wp_ref.dtype), wp_ref[...],
                      preferred_element_type=jnp.float32) + bp_ref[...]   # (tb, Dp)

        # L2 normalize (CLAP audio_embeds are unit-norm); padded lanes are 0
        sq = jnp.sum(emb * emb, axis=-1, keepdims=True)
        emb = emb * jax.lax.rsqrt(sq + 1e-12)

        # linear classification head (lane-dense padded C)
        logits = jnp.dot(emb.astype(wl_ref.dtype), wl_ref[...],
                         preferred_element_type=jnp.float32) + bl_ref[...]  # (tb, Cp)

        o_ref[...] = logits.astype(o_ref.dtype)


def prepare_clap_params(w_proj, b_proj, w_head, b_head, *, seq_len):
    """One-time model-setup step (hoisted out of the per-call forward path).

    Zero-pads the embedding / class dims to lane-dense multiples of 128 and
    pre-tiles the projection weight for the time-fold layout chosen for
    `seq_len` frames.  Zero padding is exact (padded lanes stay 0 through the
    L2 norm and head matmul).
    """
    F, D = w_proj.shape
    C = w_head.shape[1]
    g = _time_fold_factor(F, seq_len)
    Dp = _round_up(D, 128)
    Cp = _round_up(C, 128)
    wp = jnp.zeros((F, Dp), w_proj.dtype).at[:, :D].set(w_proj)
    wp = jnp.tile(wp, (g, 1))                                       # (g*F, Dp)
    bp = jnp.zeros((1, Dp), jnp.float32).at[:, :D].set(
        jnp.reshape(b_proj, (1, D)).astype(jnp.float32))
    wl = jnp.zeros((Dp, Cp), w_head.dtype).at[:D, :C].set(w_head)
    bl = jnp.zeros((1, Cp), jnp.float32).at[:, :C].set(
        jnp.reshape(b_head, (1, C)).astype(jnp.float32))
    return dict(wp=wp, bp=bp, wl=wl, bl=bl,
                g=g, F=F, D=D, C=C, T=seq_len, Dp=Dp, Cp=Cp)


def fine_tuning_clap_forward(x, params, *, tb=None, tt=None):
    """Mirrors Fine_tuning_CLAPModel.forward.

    x:      (B, T, F) or (T, F) audio features (f32 or bf16 -- streamed as-is;
            accumulation is always f32 inside the kernel).
    params: output of prepare_clap_params (padded / time-folded weights).
    returns: (B, C) logits in f32.
    """
    if x.ndim == 2:
        x = x[None, ...]                     # x.unsqueeze(0)
    B, T, F = x.shape
    if T != params["T"] or F != params["F"]:
        raise ValueError("x shape is inconsistent with prepared params")

    g, Dp, Cp = params["g"], params["Dp"], params["Cp"]
    wp, bp, wl, bl = params["wp"], params["bp"], params["wl"], params["bl"]
    Tg, Fg = T // g, g * F

    # Zero-copy fold: pack g consecutive frames into the lane dimension so the
    # streaming load/add path is lane-dense even when F < 128.
    x = jnp.reshape(x, (B, Tg, Fg))

    xbytes = jnp.dtype(x.dtype).itemsize
    wbytes = jnp.dtype(wp.dtype).itemsize
    pack = {1: 32, 2: 16}.get(xbytes, 8)     # sublane packing per stream dtype

    # ---- batch tiling (>= 2 tiles when B >= 16 so v7x megacore is used) ----
    if tb is None:
        tb = _pick_batch_tile(B)
    Bp = _round_up(B, tb)
    nb = Bp // tb

    # ---- time tiling: generation-aware VMEM budget, avoid padding x --------
    vmem_cap = _vmem_capacity_bytes()
    budget = int(vmem_cap * 0.7)             # headroom for compiler scratch
    fixed = (2 * (wp.size + wl.size) * wbytes      # (double-buffered) weights
             + 2 * (bp.size + bl.size) * 4         # biases
             + 2 * tb * Cp * 4                     # output block
             + tb * Fg * 4)                        # pooling accumulator
    stream_budget = max(budget - fixed, 1 << 20)
    tt_cap = min(stream_budget // (2 * tb * Fg * xbytes), 512)
    if tt is None:
        tt = _pick_time_tile(Tg, pack, tt_cap)

    Tgp = _round_up(Tg, tt)
    nt = Tgp // tt

    # Pad only if unavoidable (batch remainder, or a time tile that does not
    # divide Tg -- _pick_time_tile avoids the latter whenever possible); the
    # padded rows contribute 0 to the sum and padded batch rows are sliced off.
    if (Bp, Tgp) != (B, Tg):
        x = jnp.pad(x, ((0, Bp - B), (0, Tgp - Tg), (0, 0)))

    vmem_need = fixed + 2 * tb * tt * Fg * xbytes
    vmem_limit = int(min(max(int(1.25 * vmem_need) + (2 << 20), 8 << 20),
                         int(0.9 * vmem_cap)))

    cost = pl.CostEstimate(
        flops=int(Bp * Tgp * Fg                   # temporal pooling adds
                  + 2 * Bp * Fg * Dp              # projection matmul
                  + 2 * Bp * Dp * Cp              # head matmul
                  + 4 * Bp * Dp),                 # L2 normalization
        transcendentals=int(Bp),                  # one rsqrt per row
        bytes_accessed=int(Bp * Tgp * Fg * xbytes
                           + (wp.size + wl.size) * wbytes
                           + (bp.size + bl.size) * 4
                           + Bp * Cp * 4),
    )

    kernel = functools.partial(_clap_classifier_kernel, inv_t=1.0 / T)

    out = pl.pallas_call(
        kernel,
        out_shape=jax.ShapeDtypeStruct((Bp, Cp), jnp.float32),
        grid_spec=pltpu.PrefetchScalarGridSpec(
            num_scalar_prefetch=0,
            grid=(nb, nt),
            in_specs=[
                pl.BlockSpec((tb, tt, Fg), lambda b, t: (b, t, 0)),  # streamed x
                pl.BlockSpec((Fg, Dp), lambda b, t: (0, 0)),         # resident
                pl.BlockSpec((1, Dp), lambda b, t: (0, 0)),          # resident
                pl.BlockSpec((Dp, Cp), lambda b, t: (0, 0)),         # resident
                pl.BlockSpec((1, Cp), lambda b, t: (0, 0)),          # resident
            ],
            out_specs=pl.BlockSpec((tb, Cp), lambda b, t: (b, 0)),
            scratch_shapes=[pltpu.VMEM((tb, Fg), jnp.float32)],
        ),
        compiler_params=pltpu.CompilerParams(
            dimension_semantics=("parallel", "arbitrary"),
            vmem_limit_bytes=vmem_limit,
        ),
        cost_estimate=cost,
    )(x, wp, bp, wl, bl)

    return out[:B, :params["C"]]


def _reference(x, w_proj, b_proj, w_head, b_head):
    if x.ndim == 2:
        x = x[None, ...]
    pooled = jnp.mean(x.astype(jnp.float32), axis=1)
    emb = pooled @ w_proj.astype(jnp.float32) + jnp.reshape(b_proj, (1, -1)).astype(jnp.float32)
    emb = emb / jnp.sqrt(jnp.sum(emb * emb, axis=-1, keepdims=True) + 1e-12)
    return emb @ w_head.astype(jnp.float32) + jnp.reshape(b_head, (1, -1)).astype(jnp.float32)


if __name__ == "__main__":
    # small, module-consistent shapes
    B, T, F = 2, 8, 32      # batch, time frames, mel bins
    D, C = 64, 4            # embedding dim, number of vessel classes

    key = jax.random.PRNGKey(0)
    kx, kwp, kbp, kwl, kbl = jax.random.split(key, 5)

    x = jax.random.normal(kx, (B, T, F), dtype=jnp.float32)
    w_proj = jax.random.normal(kwp, (F, D), dtype=jnp.float32) * 0.05
    b_proj = jax.random.normal(kbp, (1, D), dtype=jnp.float32) * 0.01
    w_head = jax.random.normal(kwl, (D, C), dtype=jnp.float32) * 0.05
    b_head = jax.random.normal(kbl, (1, C), dtype=jnp.float32) * 0.01

    # one-time model setup (padding / time-fold tiling hoisted out of forward)
    params = prepare_clap_params(w_proj, b_proj, w_head, b_head, seq_len=T)

    logits = fine_tuning_clap_forward(x, params)
    jax.block_until_ready(logits)

    ref = _reference(x, w_proj, b_proj, w_head, b_head)
    assert logits.shape == (B, C)
    assert jnp.allclose(logits, ref, atol=1e-5, rtol=1e-5), "mismatch vs reference"

    # also exercise the 2-D input branch (x.dim() == 2 -> unsqueeze)
    logits_2d = fine_tuning_clap_forward(x[0], params)
    jax.block_until_ready(logits_2d)
    assert logits_2d.shape == (1, C)
    assert jnp.allclose(logits_2d[0], ref[0], atol=1e-5, rtol=1e-5)

    # bf16 feature streaming path (kernel accumulates in f32)
    x_bf16 = x.astype(jnp.bfloat16)
    logits_bf16 = fine_tuning_clap_forward(x_bf16, params)
    jax.block_until_ready(logits_bf16)
    ref_bf16 = _reference(x_bf16, w_proj, b_proj, w_head, b_head)
    assert jnp.allclose(logits_bf16, ref_bf16, atol=1e-4, rtol=1e-3)

    print("KERNEL_OK")
</pallas_src>

<mosaic_0001>
module attributes {stable_mosaic.version = 11 : i64} {
  func.func @_clap_classifier_kernel(%arg0: i32, %arg1: i32, %arg2: memref<2x2x128xf32, #tpu.memory_space<vmem>>, %arg3: memref<128x128xf32, #tpu.memory_space<vmem>>, %arg4: memref<1x128xf32, #tpu.memory_space<vmem>>, %arg5: memref<128x128xf32, #tpu.memory_space<vmem>>, %arg6: memref<1x128xf32, #tpu.memory_space<vmem>>, %arg7: memref<2x128xf32, #tpu.memory_space<vmem>>, %arg8: memref<2x128xf32, #tpu.memory_space<vmem>>) attributes {dimension_semantics = [#tpu.dimension_semantics<parallel>, #tpu.dimension_semantics<arbitrary>], iteration_bounds = array<i64: 1, 1>, scalar_prefetch = 0 : i64, scratch_operands = 1 : i64, tpu.core_type = #tpu.core_type<tc>, window_params = [{transform_indices = @transform_0, window_bounds = array<i64: 2, 2, 128>}, {pipeline_mode = #tpu.pipeline_mode<synchronous>, transform_indices = @transform_1, window_bounds = array<i64: 128, 128>}, {pipeline_mode = #tpu.pipeline_mode<synchronous>, transform_indices = @transform_2, window_bounds = array<i64: 1, 128>}, {pipeline_mode = #tpu.pipeline_mode<synchronous>, transform_indices = @transform_3, window_bounds = array<i64: 128, 128>}, {pipeline_mode = #tpu.pipeline_mode<synchronous>, transform_indices = @transform_4, window_bounds = array<i64: 1, 128>}, {transform_indices = @transform_5, window_bounds = array<i64: 2, 128>}]} {
    %c0_i32 = arith.constant 0 : i32
    %0 = arith.cmpi eq, %arg1, %c0_i32 : i32
    %1 = arith.extui %0 : i1 to i32
    %c0_i32_0 = arith.constant 0 : i32
    %2 = arith.cmpi ne, %1, %c0_i32_0 : i32
    scf.if %2 {
      %cst_9 = arith.constant 0.000000e+00 : f32
      %11 = vector.broadcast %cst_9 : f32 to vector<2x128xf32>
      %c0_10 = arith.constant 0 : index
      %c0_11 = arith.constant 0 : index
      %12 = vector.load %arg8[%c0_10, %c0_11] : memref<2x128xf32, #tpu.memory_space<vmem>>, vector<2x128xf32>
      tpu.vector_store %arg8[%c0_10, %c0_11], %11 {strides = array<i32>} : memref<2x128xf32, #tpu.memory_space<vmem>>, vector<2x128xf32>,
    } else {
    }
    %c0 = arith.constant 0 : index
    %c0_1 = arith.constant 0 : index
    %3 = vector.load %arg8[%c0, %c0_1] : memref<2x128xf32, #tpu.memory_space<vmem>>, vector<2x128xf32>
    %c0_2 = arith.constant 0 : index
    %c0_3 = arith.constant 0 : index
    %c0_4 = arith.constant 0 : index
    %4 = vector.load %arg2[%c0_2, %c0_3, %c0_4] : memref<2x2x128xf32, #tpu.memory_space<vmem>>, vector<2x2x128xf32>
    %cst = arith.constant dense<0.000000e+00> : vector<2x128xf32>
    %5 = vector.multi_reduction <add>, %4, %cst [1] : vector<2x2x128xf32> to vector<2x128xf32>
    %6 = arith.addf %3, %5 : vector<2x128xf32>
    %c0_5 = arith.constant 0 : index
    %c0_6 = arith.constant 0 : index
    %7 = vector.load %arg8[%c0_5, %c0_6] : memref<2x128xf32, #tpu.memory_space<vmem>>, vector<2x128xf32>
    tpu.vector_store %arg8[%c0_5, %c0_6], %6 {strides = array<i32>} : memref<2x128xf32, #tpu.memory_space<vmem>>, vector<2x128xf32>,
    %c0_i32_7 = arith.constant 0 : i32
    %8 = arith.cmpi eq, %arg1, %c0_i32_7 : i32
    %9 = arith.extui %8 : i1 to i32
    %c0_i32_8 = arith.constant 0 : i32
    %10 = arith.cmpi ne, %9, %c0_i32_8 : i32
    scf.if %10 {
      %c0_9 = arith.constant 0 : index
      %c0_10 = arith.constant 0 : index
      %11 = vector.load %arg8[%c0_9, %c0_10] : memref<2x128xf32, #tpu.memory_space<vmem>>, vector<2x128xf32>
      %cst_11 = arith.constant 1.250000e-01 : f32
      %12 = vector.broadcast %cst_11 : f32 to vector<2x128xf32>
      %13 = arith.mulf %11, %12 : vector<2x128xf32>
      %c0_12 = arith.constant 0 : index
      %c0_13 = arith.constant 0 : index
      %14 = vector.load %arg3[%c0_12, %c0_13] : memref<128x128xf32, #tpu.memory_space<vmem>>, vector<128x128xf32>
      %cst_14 = arith.constant dense<0.000000e+00> : vector<2x128xf32>
      %15 = tpu.matmul %13, %14, %cst_14 {dimension_numbers = #tpu.dot_dimension_numbers<[1], [0], [0], [1], [0, 0, 1, 1], [], []>} : vector<2x128xf32>, vector<128x128xf32>, vector<2x128xf32> -> vector<2x128xf32>
      %c0_15 = arith.constant 0 : index
      %c0_16 = arith.constant 0 : index
      %16 = vector.load %arg4[%c0_15, %c0_16] : memref<1x128xf32, #tpu.memory_space<vmem>>, vector<1x128xf32>
      %17 = vector.broadcast %16 : vector<1x128xf32> to vector<2x128xf32>
      %18 = arith.addf %15, %17 : vector<2x128xf32>
      %19 = arith.mulf %18, %18 : vector<2x128xf32>
      %cst_17 = arith.constant dense<0.000000e+00> : vector<2xf32>
      %20 = vector.multi_reduction <add>, %19, %cst_17 [1] : vector<2x128xf32> to vector<2xf32>
      %21 = vector.shape_cast %20 : vector<2xf32> to vector<2x1xf32>
      %cst_18 = arith.constant 9.99999996E-13 : f32
      %22 = vector.broadcast %cst_18 : f32 to vector<2x1xf32>
      %23 = arith.addf %21, %22 : vector<2x1xf32>
      %24 = math.rsqrt %23 : vector<2x1xf32>
      %25 = vector.broadcast %24 : vector<2x1xf32> to vector<2x128xf32>
      %26 = arith.mulf %18, %25 : vector<2x128xf32>
      %c0_19 = arith.constant 0 : index
      %c0_20 = arith.constant 0 : index
      %27 = vector.load %arg5[%c0_19, %c0_20] : memref<128x128xf32, #tpu.memory_space<vmem>>, vector<128x128xf32>
      %cst_21 = arith.constant dense<0.000000e+00> : vector<2x128xf32>
      %28 = tpu.matmul %26, %27, %cst_21 {dimension_numbers = #tpu.dot_dimension_numbers<[1], [0], [0], [1], [0, 0, 1, 1], [], []>} : vector<2x128xf32>, vector<128x128xf32>, vector<2x128xf32> -> vector<2x128xf32>
      %c0_22 = arith.constant 0 : index
      %c0_23 = arith.constant 0 : index
      %29 = vector.load %arg6[%c0_22, %c0_23] : memref<1x128xf32, #tpu.memory_space<vmem>>, vector<1x128xf32>
      %30 = vector.broadcast %29 : vector<1x128xf32> to vector<2x128xf32>
      %31 = arith.addf %28, %30 : vector<2x128xf32>
      %c0_24 = arith.constant 0 : index
      %c0_25 = arith.constant 0 : index
      %32 = vector.load %arg7[%c0_24, %c0_25] : memref<2x128xf32, #tpu.memory_space<vmem>>, vector<2x128xf32>
      tpu.vector_store %arg7[%c0_24, %c0_25], %31 {strides = array<i32>} : memref<2x128xf32, #tpu.memory_space<vmem>>, vector<2x128xf32>,
    } else {
    }
    return
  }
  func.func @transform_0(%arg0: i32, %arg1: i32) -> (i32, i32, i32) {
    %c0_i32 = arith.constant 0 : i32
    %c0_i32_0 = arith.constant 0 : i32
    return %arg0, %arg1, %c0_i32 : i32, i32, i32
  }
  func.func @transform_1(%arg0: i32, %arg1: i32) -> (i32, i32) {
    %c0_i32 = arith.constant 0 : i32
    %c0_i32_0 = arith.constant 0 : i32
    %c0_i32_1 = arith.constant 0 : i32
    return %c0_i32, %c0_i32_0 : i32, i32
  }
  func.func @transform_2(%arg0: i32, %arg1: i32) -> (i32, i32) {
    %c0_i32 = arith.constant 0 : i32
    %c0_i32_0 = arith.constant 0 : i32
    %c0_i32_1 = arith.constant 0 : i32
    return %c0_i32, %c0_i32_0 : i32, i32
  }
  func.func @transform_3(%arg0: i32, %arg1: i32) -> (i32, i32) {
    %c0_i32 = arith.constant 0 : i32
    %c0_i32_0 = arith.constant 0 : i32
    %c0_i32_1 = arith.constant 0 : i32
    return %c0_i32, %c0_i32_0 : i32, i32
  }
  func.func @transform_4(%arg0: i32, %arg1: i32) -> (i32, i32) {
    %c0_i32 = arith.constant 0 : i32
    %c0_i32_0 = arith.constant 0 : i32
    %c0_i32_1 = arith.constant 0 : i32
    return %c0_i32, %c0_i32_0 : i32, i32
  }
  func.func @transform_5(%arg0: i32, %arg1: i32) -> (i32, i32) {
    %c0_i32 = arith.constant 0 : i32
    %c0_i32_0 = arith.constant 0 : i32
    return %arg0, %c0_i32 : i32, i32
  }
}

</mosaic_0001>

<bundles_post_ra>
// kernel: tpu_custom_call.1
= control target key start
LH: loop header
LB: loop body
LE: loop exit
PB: predicated region body
PF: predicated region fallthrough
CT: control target
= control target key end

     0   :  { %10 = vsyncpa [#allocation4], 0  ;;  %s607_s0 = inlined_call_operand.hbm [shape: f32[2,2,128], index: 0, kind: input, shape index: {}]   ;;  %s608_s1 = inlined_call_operand.hbm [shape: f32[128,128], index: 1, kind: input, shape index: {}]   ;;  %s609_s2 = inlined_call_operand.vmem [shape: f32[1,128], index: 2, kind: input, shape index: {}]   ;;  %s610_s3 = inlined_call_operand.hbm [shape: f32[128,128], index: 3, kind: input, shape index: {}]   ;;  %s611_s4 = inlined_call_operand.vmem [shape: f32[1,128], index: 4, kind: input, shape index: {}]   ;;  %s612_s5 = inlined_call_operand.hbm [shape: f32[2,128], index: 5, kind: output, shape index: {}]  }
   0x1   :  { %11 = vsyncpa [#allocation7], 0 }
   0x2   :  { %12 = vsyncpa [#allocation5], 0  ;;  %s511_s18 = smov [#allocation6]  }
   0x3   :  { %s30_s19 = sshll.u32 %s511_s18, 4  ;;  %s31_s19 = int_to_ptr.vmem [resolvable:$true] %s30_s19 }
   0x4   :  { %s433_s20 = scalar_lea.vmem %s31_s19, 2048  ;;  %p438_p1 = scmp.lt.s32.totalorder %s31_s19, %s31_s19 }
   0x5   :  { %p434_p0 = scmp.ne.s32.totalorder %s31_s19, %s433_s20  ;;  %p439_p2 = scmp.lt.s32.totalorder %s433_s20, %s433_s20 }
   0x7   :  { %p440_p3 = por %p439_p2, %p438_p1 }
   0x9   :  { %p441_p4 = pnand %p440_p3, %p434_p0 }
   0xb   :  { %444 = shalt.err (!%p441_p4)
}
   0xc   :  { %s512_s21 = smov 128   ;;  %s513_s22 = smov 8  }
   0xd   :  { %36 = dma.hbm_to_vmem [thread:$0]  %s608_s1, 2048, %s31_s19, [#allocation7], %s512_s21, %s512_s21, %s513_s22  }
   0xe   :  { %s514_s25 = smov [#allocation3]  }
   0xf   :  { %s18_s26 = sshll.u32 %s514_s25, 4  ;;  %s19_s26 = int_to_ptr.vmem [resolvable:$true] %s18_s26 }
  0x10   :  { %s453_s27 = scalar_lea.vmem %s19_s26, 64  ;;  %p458_p6 = scmp.lt.s32.totalorder %s19_s26, %s19_s26 }
  0x11   :  { %p454_p5 = scmp.ne.s32.totalorder %s19_s26, %s453_s27  ;;  %p459_p7 = scmp.lt.s32.totalorder %s453_s27, %s453_s27 }
  0x13   :  { %p460_p8 = por %p459_p7, %p458_p6 }
  0x15   :  { %p461_p9 = pnand %p460_p8, %p454_p5 }
  0x17   :  { %464 = shalt.err (!%p461_p9)
}
  0x18   :  { %s515_s28 = smov 32   ;;  %s516_s29 = smov 2  }
  0x19   :  { %24 = dma.hbm_to_vmem [thread:$0]  %s607_s0, 64, %s19_s26, [#allocation4], %s515_s28, %s515_s28, %s516_s29  }
  0x1a   :  { %s517_s7 = smov [#allocation8]  }
  0x1b   :  { %s44_s8 = sshll.u32 %s517_s7, 4  ;;  %s45_s8 = int_to_ptr.vmem [resolvable:$true] %s44_s8 }
  0x1c   :  { %s473_s1 = scalar_lea.vmem %s45_s8, 2048  ;;  %p478_p11 = scmp.lt.s32.totalorder %s45_s8, %s45_s8 }
  0x1d   :  { %p474_p10 = scmp.ne.s32.totalorder %s45_s8, %s473_s1  ;;  %p479_p12 = scmp.lt.s32.totalorder %s473_s1, %s473_s1 }
  0x1f   :  { %p480_p13 = por %p479_p12, %p478_p11 }
  0x21   :  { %p481_p0 = pnand %p480_p13, %p474_p10 }
  0x23   :  { %484 = shalt.err (!%p481_p0)
}
  0x24   :  { %50 = dma.hbm_to_vmem [thread:$0]  %s610_s3, 2048, %s45_s8, [#allocation7], %s512_s21, %s512_s21, %s513_s22  }
  0x25   :  { %505 = dma.done.wait [#allocation4], 64  }
  0x26   :  { %506 = vsyncadd [#allocation4], 4294967232 }
  0x27   :  { %507 = dma.done.wait [#allocation7], 4096  }
  0x28   :  { %508 = vsyncadd [#allocation7], 4294963200  ;;  %v518_v0 = vmov 0.0   ;;  %vm519_vm0 = vmmov 0   ;;  %v112_v1 = vld [vmem:[#allocation6 + $0x78] sm:$0xff]  ;;  %v111_v2 = vld [vmem:[#allocation6 + $0x70] sm:$0xff] }
  0x29   :  { %343 = vmatprep.subr.mxu0 %v518_v0  ;;  %66 = vst [vmem:[#allocation2] sm:$0x3] %v518_v0  ;;  %375 = vmatprep.mubr.msk.f32.mxu0 %vm519_vm0, %v518_v0  ;;  %v110_v3 = vld [vmem:[#allocation6 + $0x68] sm:$0xff]  ;;  %vm70_vm1 = vcmask 1041408   ;;  %v109_v4 = vld [vmem:[#allocation6 + $0x60] sm:$0xff]  ;;  %v108_v6 = vld [vmem:[#allocation6 + $0x58] sm:$0xff] }
  0x2a   :  { %378 = vmatprep.subr.mxu1 %v518_v0  ;;  %410 = vmatprep.mubr.msk.f32.mxu1 %vm519_vm0, %v518_v0  ;;  %v68_v5 = vld [vmem:[#allocation3] sm:$0x3]  ;;  %v69_v7 = vld [vmem:[#allocation3 + $0x2] sm:$0x3]  ;;  %v107_v11 = vld [vmem:[#allocation6 + $0x50] sm:$0xff]  ;;  %vm87_vm2 = vcmask 1041409  }
  0x2b   :  { %344 = vmatpush3.msra.mxu0 %v112_v1  ;;  %v71_v8 = vsel %vm70_vm1, %v68_v5, 0.0  ;;  %v78_v10 = vsel %vm70_vm1, %v69_v7, 0.0  ;;  %v106_v14 = vld [vmem:[#allocation6 + $0x48] sm:$0xff]  ;;  %v105_v17 = vld [vmem:[#allocation6 + $0x40] sm:$0xff]  ;;  %v104_v20 = vld [vmem:[#allocation6 + $0x38] sm:$0xff]  ;;  %s520_s12 = smov [#allocation9]  }
  0x2c   :  { %345 = vmatprep.subr.mxu0 %v518_v0  ;;  %v72_v9 = vrot.slane %v71_v8, 4  ;;  %v79_v12 = vrot.slane %v78_v10, 4  ;;  %v103_v23 = vld [vmem:[#allocation6 + $0x30] sm:$0xff]  ;;  %v102_v26 = vld [vmem:[#allocation6 + $0x28] sm:$0xff]  ;;  %v101_v29 = vld [vmem:[#allocation6 + $0x20] sm:$0xff]  ;;  %s297_s13 = sshll.u32 %s520_s12, 4  ;;  %s298_s13 = int_to_ptr.vmem [resolvable:$true] %s297_s13 }
  0x2d   :  { %346 = vmatpush3.msra.mxu0 %v111_v2  ;;  %v100_v32 = vld [vmem:[#allocation6 + $0x18] sm:$0xff]  ;;  %v99_v33 = vld [vmem:[#allocation6 + $0x10] sm:$0xff]  ;;  %v98_v34 = vld [vmem:[#allocation6 + $0x8] sm:$0xff]  ;;  %s485_s14 = scalar_lea.vmem %s298_s13, 32  ;;  %p490_p2 = scmp.lt.s32.totalorder %s298_s13, %s298_s13 }
  0x2e   :  { %347 = vmatprep.subr.mxu0 %v518_v0  ;;  %v73_v13 = vadd.f32 %v72_v9, %v71_v8  ;;  %v80_v15 = vadd.f32 %v79_v12, %v78_v10  ;;  %v97_v35 = vld [vmem:[#allocation6] sm:$0xff]  ;;  %v212_v38 = vld [vmem:[#allocation8 + $0x78] sm:$0xff]  ;;  %v211_v39 = vld [vmem:[#allocation8 + $0x70] sm:$0xff]  ;;  %p486_p1 = scmp.ne.s32.totalorder %s298_s13, %s485_s14  ;;  %p491_p3 = scmp.lt.s32.totalorder %s485_s14, %s485_s14 }
  0x2f   :  { %348 = vmatpush3.msra.mxu0 %v110_v3  ;;  %379 = vmatpush3.msra.mxu1 %v212_v38  ;;  %v210_v40 = vld [vmem:[#allocation8 + $0x68] sm:$0xff]  ;;  %v209_v41 = vld [vmem:[#allocation8 + $0x60] sm:$0xff]  ;;  %v208_v42 = vld [vmem:[#allocation8 + $0x58] sm:$0xff] }
  0x30   :  { %349 = vmatprep.subr.mxu0 %v518_v0  ;;  %v74_v16 = vrot.slane %v73_v13, 2  ;;  %v81_v18 = vrot.slane %v80_v15, 2  ;;  %v67_v27 = vld [vmem:[#allocation2] sm:$0x3]  ;;  %380 = vmatprep.subr.mxu1 %v518_v0  ;;  %v207_v43 = vld [vmem:[#allocation8 + $0x50] sm:$0xff]  ;;  %v206_v50 = vld [vmem:[#allocation8 + $0x48] sm:$0xff]  ;;  %p492_p4 = por %p491_p3, %p490_p2 }
  0x31   :  { %350 = vmatpush3.msra.mxu0 %v109_v4  ;;  %381 = vmatpush3.msra.mxu1 %v211_v39  ;;  %v307_v44 = vld [vmem:[%s609_s2] ss:$0 sm:$0xff]  ;;  %v205_v51 = vld [vmem:[#allocation8 + $0x40] sm:$0xff]  ;;  %v203_v53 = vld [vmem:[#allocation8 + $0x30] sm:$0xff] }
  0x32   :  { %351 = vmatprep.subr.mxu0 %v518_v0  ;;  %v75_v19 = vadd.f32 %v74_v16, %v73_v13  ;;  %v82_v21 = vadd.f32 %v81_v18, %v80_v15  ;;  %382 = vmatprep.subr.mxu1 %v518_v0  ;;  %v204_v52 = vld [vmem:[#allocation8 + $0x38] sm:$0xff]  ;;  %v202_v54 = vld [vmem:[#allocation8 + $0x28] sm:$0xff]  ;;  %v201_v55 = vld [vmem:[#allocation8 + $0x20] sm:$0xff]  ;;  %p493_p5 = pnand %p492_p4, %p486_p1 }
  0x33   :  { %352 = vmatpush3.msra.mxu0 %v108_v6  ;;  %383 = vmatpush3.msra.mxu1 %v210_v40  ;;  %v200_v56 = vld [vmem:[#allocation8 + $0x18] sm:$0xff]  ;;  %v199_v57 = vld [vmem:[#allocation8 + $0x10] sm:$0xff]  ;;  %v198_v58 = vld [vmem:[#allocation8 + $0x8] sm:$0xff] }
  0x34   :  { %353 = vmatprep.subr.mxu0 %v518_v0  ;;  %v76_v22 = vrot.slane %v75_v19, 1  ;;  %v83_v24 = vrot.slane %v82_v21, 1  ;;  %384 = vmatprep.subr.mxu1 %v518_v0  ;;  %v197_v59 = vld [vmem:[#allocation8] sm:$0xff]  ;;  %v308_v1 = vld [vmem:[%s611_s4] ss:$0 sm:$0xff] }
  0x35   :  { %354 = vmatpush3.msra.mxu0 %v107_v11  ;;  %385 = vmatpush3.msra.mxu1 %v209_v41 }
  0x36   :  { %355 = vmatprep.subr.mxu0 %v518_v0  ;;  %v77_v25 = vadd.f32 %v76_v22, %v75_v19  ;;  %v84_v28 = vadd.f32 %v83_v24, %v82_v21  ;;  %386 = vmatprep.subr.mxu1 %v518_v0 }
  0x37   :  { %356 = vmatpush3.msra.mxu0 %v106_v14  ;;  %387 = vmatpush3.msra.mxu1 %v208_v42 }
  0x38   :  { %357 = vmatprep.subr.mxu0 %v518_v0  ;;  %v88_v30 = vsel %vm87_vm2, %v84_v28, %v77_v25  ;;  %388 = vmatprep.subr.mxu1 %v518_v0 }
  0x39   :  { %358 = vmatpush3.msra.mxu0 %v105_v17  ;;  %v90_v31 = vadd.f32 %v88_v30, %v67_v27  ;;  %389 = vmatpush3.msra.mxu1 %v207_v43 }
  0x3a   :  { %359 = vmatprep.subr.mxu0 %v518_v0  ;;  %390 = vmatprep.subr.mxu1 %v518_v0 }
  0x3b   :  { %360 = vmatpush3.msra.mxu0 %v104_v20  ;;  %91 = vst [vmem:[#allocation2] sm:$0x3] %v90_v31  ;;  %391 = vmatpush3.msra.mxu1 %v206_v50 }
  0x3c   :  { %361 = vmatprep.subr.mxu0 %v518_v0  ;;  %392 = vmatprep.subr.mxu1 %v518_v0 }
  0x3d   :  { %362 = vmatpush3.msra.mxu0 %v103_v23  ;;  %393 = vmatpush3.msra.mxu1 %v205_v51 }
  0x3e   :  { %363 = vmatprep.subr.mxu0 %v518_v0  ;;  %394 = vmatprep.subr.mxu1 %v518_v0 }
  0x3f   :  { %364 = vmatpush3.msra.mxu0 %v102_v26  ;;  %395 = vmatpush3.msra.mxu1 %v204_v52 }
  0x40   :  { %365 = vmatprep.subr.mxu0 %v518_v0  ;;  %396 = vmatprep.subr.mxu1 %v518_v0 }
  0x41   :  { %366 = vmatpush3.msra.mxu0 %v101_v29  ;;  %397 = vmatpush3.msra.mxu1 %v203_v53 }
  0x42   :  { %367 = vmatprep.subr.mxu0 %v518_v0  ;;  %v95_v36 = vld [vmem:[#allocation2] sm:$0x3]  ;;  %398 = vmatprep.subr.mxu1 %v518_v0 }
  0x43   :  { %368 = vmatpush3.msra.mxu0 %v100_v32  ;;  %v96_v37 = vmul.f32 0.125, %v95_v36  ;;  %399 = vmatpush3.msra.mxu1 %v202_v54 }
  0x44   :  { %369 = vmatprep.subr.mxu0 %v518_v0  ;;  %400 = vmatprep.subr.mxu1 %v518_v0 }
  0x45   :  { %370 = vmatpush3.msra.mxu0 %v99_v33  ;;  %401 = vmatpush3.msra.mxu1 %v201_v55 }
  0x46   :  { %371 = vmatprep.subr.mxu0 %v518_v0  ;;  %402 = vmatprep.subr.mxu1 %v518_v0 }
  0x47   :  { %372 = vmatpush3.msra.mxu0 %v98_v34  ;;  %403 = vmatpush3.msra.mxu1 %v200_v56 }
  0x48   :  { %373 = vmatprep.subr.mxu0 %v518_v0  ;;  %404 = vmatprep.subr.mxu1 %v518_v0 }
  0x49   :  { %374 = vmatpush3.msra.mxu0 %v97_v35  ;;  %405 = vmatpush3.msra.mxu1 %v199_v57 }
  0x4a   :  { %376 = vmatmul.mubr.f32.vlgmr.msra.gmra.mxu0 %v96_v37  ;;  %406 = vmatprep.subr.mxu1 %v518_v0 }
  0x4b   :  { %407 = vmatpush3.msra.mxu1 %v198_v58 }
  0x4c   :  { %408 = vmatprep.subr.mxu1 %v518_v0 }
  0x4d   :  { %409 = vmatpush3.msra.mxu1 %v197_v59 }
 0x10a   :  { %v186_v45 = vpop.f32.mrf.mxu0 }
 0x10b   :  { %v187_v46 = vadd.f32 %v307_v44, %v186_v45 }
 0x10c   :  { %v377_v47 = vpop.f32.mrf.mxu0 }
 0x10d   :  { %v190_v48 = vmul.f32 %v187_v46, %v187_v46 }
 0x10f   :  { %v191_v49 = vsel %vm70_vm1, %v190_v48, 0.0 }
 0x110   :  { %192 = vadd.xlane.f32.xlu0 %v191_v49 }
 0x199   :  { %v193_v60 = vpop.xlane.xlu0 %192 }
 0x19a   :  { %v194_v61 = vadd.f32 1e-12, %v193_v60 }
 0x19c   :  { %423 = vrsqrt.f32 %v194_v61 }
 0x1a9   :  { %v424_v62 = vpop.eup %423 }
 0x1aa   :  { %v196_v63 = vmul.f32 %v424_v62, %v187_v46 }
 0x1ac   :  { %411 = vmatmul.mubr.f32.vlgmr.msra.gmra.mxu1 %v196_v63 }
 0x26c   :  { %v286_v2 = vpop.f32.mrf.mxu1 }
 0x26d   :  { %v287_v3 = vadd.f32 %v308_v1, %v286_v2 }
 0x26e   :  { %v412_v4 = vpop.f32.mrf.mxu1 }
 0x26f   :  { %290 = vst [vmem:[#allocation9] sm:$0x3] %v287_v3 }
 0x270   :  { %496 = shalt.err (!%p493_p5)
}
 0x271   :  { %300 = dma.vmem_to_hbm [thread:$0]  %s298_s13, 32, %s612_s5, [#allocation5]  }
 0x272   :  { %509 = dma.done.wait [#allocation5], 32  }
 0x273   :  { %510 = vsyncadd [#allocation5], 4294967264 }
 0x274   :  { %304 = vsyncpa [#allocation4], 1 }
 0x275   :  { %305 = vsyncpa [#allocation7], 1 }
 0x276   :  { %306 = vsyncpa [#allocation5], 1 }

</bundles_post_ra>
